<compile_context>
chip_gen: v5e
topology: v5e:2x2
jax: 0.10.0
libtpu: 0.0.40
codegen_flags: <defaults>
</compile_context>

<pallas_src>
import functools

import jax
import jax.numpy as jnp
from jax.experimental import pallas as pl
from jax.experimental.pallas import tpu as pltpu


def _round_up(a: int, b: int) -> int:
    return ((a + b - 1) // b) * b


def _dropout3d_kernel(x_ref, f_ref, o_ref):
    """One grid step: (rblk, lblk) slab of channels x flattened spatial.

    f_ref is (rblk, 1) f32 = keep * 1/(1-p) per channel; a single broadcast
    multiply is the entire hot path.  Multiply happens in f32 (promotion) and
    is cast back to the output dtype.
    """
    o_ref[...] = (x_ref[...] * f_ref[...]).astype(o_ref.dtype)


def dropout3d_pallas(x, channel_factors):
    """Apply channel-wise dropout.

    x:               (N, C, D, H, W)
    channel_factors: (N*C,) float32, each entry either 0.0 or 1/(1-p).
    """
    N, C, D, H, W = x.shape
    rows = N * C
    L = D * H * W
    itemsize = jnp.dtype(x.dtype).itemsize

    # Lane block: lane-dense (multiple of 128), capped so a block stays small
    # enough to double-buffer comfortably on every generation (v5e's 16 MiB
    # scoped default included: <= ~2 MiB per buffer, 4 buffers in flight).
    LANE_CAP = 32768  # elements along the lane axis
    lblk = min(_round_up(L, 128), LANE_CAP)
    Lp = _round_up(L, lblk)

    # Row block: multiple of 8 channels, sized to keep the block <= ~2 MiB.
    target_bytes = 2 * 1024 * 1024
    rblk = max(8, (target_bytes // (lblk * itemsize)) // 8 * 8)
    rows_p = _round_up(rows, 8)
    rblk = min(rblk, rows_p)
    rows_p = _round_up(rows, rblk)

    # Flatten + pad to (rows_p, Lp); padded region multiplies zeros -> zeros.
    x2 = x.reshape(rows, L)
    x2 = jnp.pad(x2, ((0, rows_p - rows), (0, Lp - L)))
    f2 = jnp.pad(channel_factors.astype(jnp.float32).reshape(rows, 1),
                 ((0, rows_p - rows), (0, 0)))

    grid = (rows_p // rblk, Lp // lblk)

    out2 = pl.pallas_call(
        _dropout3d_kernel,
        out_shape=jax.ShapeDtypeStruct((rows_p, Lp), x.dtype),
        grid=grid,
        in_specs=[
            pl.BlockSpec((rblk, lblk), lambda i, j: (i, j)),
            pl.BlockSpec((rblk, 1), lambda i, j: (i, 0)),
        ],
        out_specs=pl.BlockSpec((rblk, lblk), lambda i, j: (i, j)),
        compiler_params=pltpu.CompilerParams(
            dimension_semantics=("parallel", "parallel"),
        ),
        cost_estimate=pl.CostEstimate(
            flops=rows_p * Lp,
            transcendentals=0,
            bytes_accessed=2 * rows_p * Lp * itemsize + rows_p * 4,
        ),
    )(x2, f2)

    return out2[:rows, :L].reshape(N, C, D, H, W)


class Fixable3DDropout:
    """JAX/Pallas port of advchain Fixable3DDropout.

    Stores the last used seed; with lazy_load=True it reuses that seed so the
    same channel mask is regenerated on the next forward call.
    """

    def __init__(self, p: float = 0.5, inplace: bool = False,
                 lazy_load: bool = False, training: bool = True):
        if p < 0 or p > 1:
            raise ValueError(
                "dropout probability has to be between 0 and 1, but got {}".format(p))
        self.p = p
        self.inplace = inplace  # no-op in JAX (arrays are immutable)
        self.seed = None
        self.lazy_load = lazy_load
        self.training = training
        self._seed_counter = 0  # deterministic stand-in for torch.seed()

    def _new_seed(self):
        self._seed_counter += 1
        return 1234 + self._seed_counter

    def forward(self, X):
        if self.training:
            if self.lazy_load and self.seed is not None:
                seed = self.seed
            else:
                seed = self._new_seed()
        else:
            seed = self._new_seed()
        self.seed = seed

        if not self.training or self.p == 0.0:
            return X
        if self.p == 1.0:
            return jnp.zeros_like(X)

        # Per-channel keep/scale factors, a pure function of (seed, channel).
        N, C = X.shape[0], X.shape[1]
        key = jax.random.PRNGKey(seed)
        keep = jax.random.bernoulli(key, 1.0 - self.p, (N * C,))
        factors = keep.astype(jnp.float32) * jnp.float32(1.0 / (1.0 - self.p))

        return dropout3d_pallas(X, factors)

    __call__ = forward


if __name__ == "__main__":
    key = jax.random.PRNGKey(0)
    N, C, D, H, W = 2, 4, 4, 8, 16
    x = jax.random.normal(key, (N, C, D, H, W), dtype=jnp.float32)

    layer = Fixable3DDropout(p=0.5, lazy_load=True, training=True)
    y = layer(x)
    y = jax.block_until_ready(y)

    # Sanity: every (n, c) channel is either all-zero or equal to x / (1 - p).
    import numpy as np
    xn = np.asarray(x).reshape(N * C, -1)
    yn = np.asarray(y).reshape(N * C, -1)
    scale = 1.0 / (1.0 - layer.p)
    for i in range(N * C):
        is_zero = np.allclose(yn[i], 0.0)
        is_scaled = np.allclose(yn[i], xn[i] * scale, rtol=1e-5, atol=1e-5)
        assert is_zero or is_scaled, f"channel {i} is neither dropped nor scaled"

    # lazy_load: same stored seed -> identical mask on the next call.
    y2 = jax.block_until_ready(layer(x))
    assert np.allclose(np.asarray(y), np.asarray(y2)), "lazy_load mask mismatch"

    print("KERNEL_OK")
</pallas_src>

<mosaic_0001>
module attributes {stable_mosaic.version = 11 : i64} {
  func.func @_dropout3d_kernel(%arg0: i32, %arg1: i32, %arg2: memref<8x512xf32, #tpu.memory_space<vmem>>, %arg3: memref<8x1xf32, #tpu.memory_space<vmem>>, %arg4: memref<8x512xf32, #tpu.memory_space<vmem>>) attributes {dimension_semantics = [#tpu.dimension_semantics<parallel>, #tpu.dimension_semantics<parallel>], iteration_bounds = array<i64: 1, 1>, scalar_prefetch = 0 : i64, scratch_operands = 0 : i64, tpu.core_type = #tpu.core_type<tc>, window_params = [{transform_indices = @transform_0, window_bounds = array<i64: 8, 512>}, {transform_indices = @transform_1, window_bounds = array<i64: 8, 1>}, {transform_indices = @transform_2, window_bounds = array<i64: 8, 512>}]} {
    %c0 = arith.constant 0 : index
    %c0_0 = arith.constant 0 : index
    %0 = vector.load %arg2[%c0, %c0_0] : memref<8x512xf32, #tpu.memory_space<vmem>>, vector<8x512xf32>
    %c0_1 = arith.constant 0 : index
    %c0_2 = arith.constant 0 : index
    %1 = vector.load %arg3[%c0_1, %c0_2] : memref<8x1xf32, #tpu.memory_space<vmem>>, vector<8x1xf32>
    %2 = vector.broadcast %1 : vector<8x1xf32> to vector<8x512xf32>
    %3 = arith.mulf %0, %2 : vector<8x512xf32>
    %c0_3 = arith.constant 0 : index
    %c0_4 = arith.constant 0 : index
    %4 = vector.load %arg4[%c0_3, %c0_4] : memref<8x512xf32, #tpu.memory_space<vmem>>, vector<8x512xf32>
    tpu.vector_store %arg4[%c0_3, %c0_4], %3 {strides = array<i32>} : memref<8x512xf32, #tpu.memory_space<vmem>>, vector<8x512xf32>,
    return
  }
  func.func @transform_0(%arg0: i32, %arg1: i32) -> (i32, i32) {
    %c0_i32 = arith.constant 0 : i32
    return %arg0, %arg1 : i32, i32
  }
  func.func @transform_1(%arg0: i32, %arg1: i32) -> (i32, i32) {
    %c0_i32 = arith.constant 0 : i32
    %c0_i32_0 = arith.constant 0 : i32
    return %arg0, %c0_i32 : i32, i32
  }
  func.func @transform_2(%arg0: i32, %arg1: i32) -> (i32, i32) {
    %c0_i32 = arith.constant 0 : i32
    return %arg0, %arg1 : i32, i32
  }
}

</mosaic_0001>

<bundles_post_ra>
// kernel: tpu_custom_call.1
= control target key start
LH: loop header
LB: loop body
LE: loop exit
PB: predicated region body
PF: predicated region fallthrough
CT: control target
= control target key end

     0   :  { %7 = vsyncpa [#allocation3], 0  ;;  %s144_s0 = inlined_call_operand.hbm [shape: f32[8,512], index: 0, kind: input, shape index: {}]   ;;  %s145_s1 = inlined_call_operand.vmem [shape: f32[8,1], index: 1, kind: input, shape index: {}]   ;;  %s146_s2 = inlined_call_operand.hbm [shape: f32[8,512], index: 2, kind: output, shape index: {}]  }
   0x1   :  { %8 = vsyncpa [#allocation4], 0  ;;  %s14_s11 = sshll.u32 %s144_s0, 4  ;;  %s117_s12 = smov [#allocation2]   ;;  %s15_s11 = int_to_ptr.hbm [resolvable:$true] %s14_s11 }
   0x2   :  { %s16_s13 = sshll.u32 %s117_s12, 4  ;;  %s17_s13 = int_to_ptr.vmem [resolvable:$true] %s16_s13 }
   0x3   :  { %19 = dma.hbm_to_vmem [thread:$0]  %s15_s11, 512, %s17_s13, [#allocation3]  }
   0x4   :  { %113 = dma.done.wait [#allocation3], 512  }
   0x5   :  { %114 = vsyncadd [#allocation3], 4294966784  ;;  %v118_v0 = vmov 0   ;;  %v30_v1 = vld [vmem:[%s145_s1] sm:$0xff]  ;;  %v27_v3 = vld [vmem:[#allocation2 + $0x8] sm:$0xff]  ;;  %s119_s0 = smov [#allocation5]  }
   0x6   :  { %64 = vset.pattern.permute.xlu0 %v118_v0  ;;  %v26_v2 = vld [vmem:[#allocation2] sm:$0xff]  ;;  %v28_v4 = vld [vmem:[#allocation2 + $0x10] sm:$0xff]  ;;  %v29_v5 = vld [vmem:[#allocation2 + $0x18] sm:$0xff]  ;;  %s49_s16 = sshll.u32 %s119_s0, 4  ;;  %s51_s19 = sshll.u32 %s146_s2, 4  ;;  %s50_s16 = int_to_ptr.vmem [resolvable:$true] %s49_s16  ;;  %s52_s19 = int_to_ptr.hbm [resolvable:$true] %s51_s19 }
   0x7   :  { %33 = vperm.xlu0 %64, %v30_v1  }
  0x79   :  { %v34_v6 = vpop.permute.xlu0 %33 }
  0x7a   :  { %v36_v7 = vmul.f32 %v34_v6, %v26_v2  ;;  %v37_v8 = vmul.f32 %v34_v6, %v27_v3  ;;  %v38_v9 = vmul.f32 %v34_v6, %v28_v4  ;;  %v39_v10 = vmul.f32 %v34_v6, %v29_v5 }
  0x7c   :  { %40 = vst [vmem:[#allocation5] sm:$0xff] %v36_v7 }
  0x7d   :  { %41 = vst [vmem:[#allocation5 + $0x8] sm:$0xff] %v37_v8 }
  0x7e   :  { %42 = vst [vmem:[#allocation5 + $0x10] sm:$0xff] %v38_v9 }
  0x7f   :  { %43 = vst [vmem:[#allocation5 + $0x18] sm:$0xff] %v39_v10 }
  0x80   :  { %54 = dma.vmem_to_hbm [thread:$0]  %s50_s16, 512, %s52_s19, [#allocation4]  }
  0x81   :  { %115 = dma.done.wait [#allocation4], 512  }
  0x82   :  { %116 = vsyncadd [#allocation4], 4294966784 }
  0x83   :  { %59 = vsyncpa [#allocation3], 1 }
  0x84   :  { %60 = vsyncpa [#allocation4], 1 }

</bundles_post_ra>
